<compile_context>
chip_gen: v7x
topology: tpu7x:2x2x1
jax: 0.10.0
libtpu: 0.0.40
codegen_flags: <defaults>
</compile_context>

<pallas_src>
import functools

import jax
import jax.numpy as jnp
from jax.experimental import pallas as pl
from jax.experimental.pallas import tpu as pltpu


def _se_kernel(x_ref, w1_ref, w2_ref, o_ref, *, inv_hw):
    # --- global average pool over the (zero-padded) spatial lane axis ---
    # Padded lanes are zero, so sum * (1 / true_HW) is the exact mean; dtype=f32 keeps the
    # reduction in f32 without materializing an f32 copy of the whole slab.
    pooled = jnp.sum(x_ref[...], axis=-1, dtype=jnp.float32) * inv_hw        # (tb, C)

    # --- gate = sigmoid( SiLU(pooled @ W1) @ W2 ), no biases ---
    h = jnp.dot(pooled, w1_ref[...], preferred_element_type=jnp.float32)     # (tb, Hd)
    h = h * jax.nn.sigmoid(h)                                                # SiLU
    g = jnp.dot(h, w2_ref[...], preferred_element_type=jnp.float32)          # (tb, C)
    gate = jax.nn.sigmoid(g)

    # --- scale: re-read the slab and broadcast the (tb, C) gate over the spatial axis ---
    o_ref[...] = x_ref[...] * gate.astype(o_ref.dtype)[:, :, None]


def _tpu_info():
    """(tensorcores per chip, per-core VMEM bytes) with conservative fallbacks."""
    kind = ""
    try:
        kind = (jax.devices()[0].device_kind or "").lower()
    except Exception:
        pass
    if "7" in kind:                       # v7x: 2 TCs per chip, 64 MiB VMEM per TC
        return 2, 64 << 20
    return 1, 128 << 20                   # v5e / v6e: 1 TC, 128 MiB VMEM


def _pick_tb(B, per_b_bytes, num_tc, vmem_bytes, target_bytes=1 << 20):
    """Batch tile: (a) >= ~1 MiB of x per step so HBM time dominates the ~0.35us step
    overhead, (b) double-buffered in+out slabs fit a conservative VMEM budget,
    (c) grid length stays >= num_tc so every TensorCore has work."""
    budget = int(0.625 * vmem_bytes)                    # ~40 MiB v7x, ~80 MiB v5e/v6e
    tb = max(1, -(-target_bytes // per_b_bytes))        # ceil(target / per_b)
    tb = min(tb, max(1, budget // (4 * per_b_bytes)))   # 2x buffers for input + output
    if B >= num_tc:
        tb = min(tb, B // num_tc)
    tb = max(1, min(tb, B))
    while B % tb:                                       # keep the grid exact
        tb -= 1
    return tb


def squeeze_excitation(x, w1, w2, *, tb=None):
    """x: (B, C, H, W).  w1: (C, Hd) == torch Linear1.weight.T;  w2: (Hd, C) == Linear2.weight.T."""
    B, C, H, W = x.shape
    Hd = w1.shape[1]
    HW = H * W
    HW_pad = -(-HW // 128) * 128          # lane-dense: pad spatial axis to a multiple of 128

    x3 = x.reshape(B, C, HW)
    if HW_pad != HW:
        x3 = jnp.pad(x3, ((0, 0), (0, 0), (0, HW_pad - HW)))   # zeros: sum unaffected

    dtype_bytes = jnp.dtype(x.dtype).itemsize
    per_b_bytes = C * HW_pad * dtype_bytes
    num_tc, vmem_bytes = _tpu_info()
    if tb is None:
        tb = _pick_tb(B, per_b_bytes, num_tc, vmem_bytes)
    assert B % tb == 0, "batch must be divisible by the batch tile"

    w_bytes = w1.size * jnp.dtype(w1.dtype).itemsize + w2.size * jnp.dtype(w2.dtype).itemsize
    need = 4 * tb * per_b_bytes + 2 * w_bytes + (2 << 20)
    vmem_limit = int(min(max(need, 32 << 20), 0.75 * vmem_bytes))

    out = pl.pallas_call(
        functools.partial(_se_kernel, inv_hw=1.0 / HW),
        out_shape=jax.ShapeDtypeStruct((B, C, HW_pad), x.dtype),
        grid_spec=pltpu.PrefetchScalarGridSpec(
            num_scalar_prefetch=0,
            grid=(B // tb,),
            in_specs=[
                pl.BlockSpec((tb, C, HW_pad), lambda i: (i, 0, 0)),   # x slab
                pl.BlockSpec((C, Hd), lambda i: (0, 0)),              # W1 (resident)
                pl.BlockSpec((Hd, C), lambda i: (0, 0)),              # W2 (resident)
            ],
            out_specs=pl.BlockSpec((tb, C, HW_pad), lambda i: (i, 0, 0)),
        ),
        compiler_params=pltpu.CompilerParams(
            dimension_semantics=("parallel",),
            vmem_limit_bytes=vmem_limit,
        ),
    )(x3, w1, w2)

    if HW_pad != HW:
        out = out[..., :HW]
    return out.reshape(B, C, H, W)


def reference(x, w1, w2):
    xf = x.astype(jnp.float32)
    pooled = jnp.mean(xf, axis=(2, 3))                               # (B, C)
    h = pooled @ w1
    h = h * jax.nn.sigmoid(h)                                        # SiLU
    gate = jax.nn.sigmoid(h @ w2)                                    # (B, C)
    return (xf * gate[:, :, None, None]).astype(x.dtype)


if __name__ == "__main__":
    B, C, H, W = 2, 32, 16, 16
    shrinkage_rate = 0.25
    Hd = int(C * shrinkage_rate)                                     # 8

    key = jax.random.PRNGKey(0)
    kx, k1, k2 = jax.random.split(key, 3)

    x = jax.random.normal(kx, (B, C, H, W), dtype=jnp.float32)
    # Linear(dim, hidden, bias=False) / Linear(hidden, dim, bias=False): weights passed
    # pre-transposed so the kernel computes pooled @ w1 (== pooled @ torch_w1.T).
    w1 = jax.random.normal(k1, (C, Hd), dtype=jnp.float32) * (1.0 / C) ** 0.5
    w2 = jax.random.normal(k2, (Hd, C), dtype=jnp.float32) * (1.0 / Hd) ** 0.5

    out = squeeze_excitation(x, w1, w2)
    out = jax.block_until_ready(out)

    ref = reference(x, w1, w2)
    assert out.shape == x.shape and out.dtype == x.dtype
    err = float(jnp.max(jnp.abs(out - ref)))
    assert jnp.allclose(out, ref, atol=1e-4, rtol=1e-4), err

    print("KERNEL_OK")
</pallas_src>

<mosaic_0001>
module attributes {stable_mosaic.version = 11 : i64} {
  func.func @_se_kernel(%arg0: i32, %arg1: memref<2x32x256xf32, #tpu.memory_space<vmem>>, %arg2: memref<32x8xf32, #tpu.memory_space<vmem>>, %arg3: memref<8x32xf32, #tpu.memory_space<vmem>>, %arg4: memref<2x32x256xf32, #tpu.memory_space<vmem>>) attributes {dimension_semantics = [#tpu.dimension_semantics<parallel>], iteration_bounds = array<i64: 1>, scalar_prefetch = 0 : i64, scratch_operands = 0 : i64, tpu.core_type = #tpu.core_type<tc>, window_params = [{transform_indices = @transform_0, window_bounds = array<i64: 2, 32, 256>}, {pipeline_mode = #tpu.pipeline_mode<synchronous>, transform_indices = @transform_1, window_bounds = array<i64: 32, 8>}, {pipeline_mode = #tpu.pipeline_mode<synchronous>, transform_indices = @transform_2, window_bounds = array<i64: 8, 32>}, {transform_indices = @transform_3, window_bounds = array<i64: 2, 32, 256>}]} {
    %c0 = arith.constant 0 : index
    %c0_0 = arith.constant 0 : index
    %c0_1 = arith.constant 0 : index
    %0 = vector.load %arg1[%c0, %c0_0, %c0_1] : memref<2x32x256xf32, #tpu.memory_space<vmem>>, vector<2x32x256xf32>
    %cst = arith.constant dense<0.000000e+00> : vector<2x32xf32>
    %1 = vector.multi_reduction <add>, %0, %cst [2] : vector<2x32x256xf32> to vector<2x32xf32>
    %cst_2 = arith.constant 3.906250e-03 : f32
    %2 = vector.broadcast %cst_2 : f32 to vector<2x32xf32>
    %3 = arith.mulf %1, %2 : vector<2x32xf32>
    %c0_3 = arith.constant 0 : index
    %c0_4 = arith.constant 0 : index
    %4 = vector.load %arg2[%c0_3, %c0_4] : memref<32x8xf32, #tpu.memory_space<vmem>>, vector<32x8xf32>
    %cst_5 = arith.constant dense<0.000000e+00> : vector<2x8xf32>
    %5 = tpu.matmul %3, %4, %cst_5 {dimension_numbers = #tpu.dot_dimension_numbers<[1], [0], [0], [1], [0, 0, 1, 1], [], []>} : vector<2x32xf32>, vector<32x8xf32>, vector<2x8xf32> -> vector<2x8xf32>
    %6 = arith.negf %5 : vector<2x8xf32>
    %7 = math.exp %6 : vector<2x8xf32>
    %cst_6 = arith.constant 1.000000e+00 : f32
    %8 = vector.broadcast %cst_6 : f32 to vector<2x8xf32>
    %9 = arith.addf %8, %7 : vector<2x8xf32>
    %10 = arith.divf %8, %9 : vector<2x8xf32>
    %11 = arith.mulf %5, %10 : vector<2x8xf32>
    %c0_7 = arith.constant 0 : index
    %c0_8 = arith.constant 0 : index
    %12 = vector.load %arg3[%c0_7, %c0_8] : memref<8x32xf32, #tpu.memory_space<vmem>>, vector<8x32xf32>
    %cst_9 = arith.constant dense<0.000000e+00> : vector<2x32xf32>
    %13 = tpu.matmul %11, %12, %cst_9 {dimension_numbers = #tpu.dot_dimension_numbers<[1], [0], [0], [1], [0, 0, 1, 1], [], []>} : vector<2x8xf32>, vector<8x32xf32>, vector<2x32xf32> -> vector<2x32xf32>
    %14 = arith.negf %13 : vector<2x32xf32>
    %15 = math.exp %14 : vector<2x32xf32>
    %cst_10 = arith.constant 1.000000e+00 : f32
    %16 = vector.broadcast %cst_10 : f32 to vector<2x32xf32>
    %17 = arith.addf %16, %15 : vector<2x32xf32>
    %18 = arith.divf %16, %17 : vector<2x32xf32>
    %c0_11 = arith.constant 0 : index
    %c0_12 = arith.constant 0 : index
    %c0_13 = arith.constant 0 : index
    %19 = vector.load %arg1[%c0_11, %c0_12, %c0_13] : memref<2x32x256xf32, #tpu.memory_space<vmem>>, vector<2x32x256xf32>
    %20 = vector.shape_cast %18 : vector<2x32xf32> to vector<2x32x1xf32>
    %21 = vector.broadcast %20 : vector<2x32x1xf32> to vector<2x32x256xf32>
    %22 = arith.mulf %19, %21 : vector<2x32x256xf32>
    %c0_14 = arith.constant 0 : index
    %c0_15 = arith.constant 0 : index
    %c0_16 = arith.constant 0 : index
    %23 = vector.load %arg4[%c0_14, %c0_15, %c0_16] : memref<2x32x256xf32, #tpu.memory_space<vmem>>, vector<2x32x256xf32>
    tpu.vector_store %arg4[%c0_14, %c0_15, %c0_16], %22 {strides = array<i32>} : memref<2x32x256xf32, #tpu.memory_space<vmem>>, vector<2x32x256xf32>,
    return
  }
  func.func @transform_0(%arg0: i32) -> (i32, i32, i32) {
    %c0_i32 = arith.constant 0 : i32
    %c0_i32_0 = arith.constant 0 : i32
    %c0_i32_1 = arith.constant 0 : i32
    return %arg0, %c0_i32, %c0_i32_0 : i32, i32, i32
  }
  func.func @transform_1(%arg0: i32) -> (i32, i32) {
    %c0_i32 = arith.constant 0 : i32
    %c0_i32_0 = arith.constant 0 : i32
    %c0_i32_1 = arith.constant 0 : i32
    return %c0_i32, %c0_i32_0 : i32, i32
  }
  func.func @transform_2(%arg0: i32) -> (i32, i32) {
    %c0_i32 = arith.constant 0 : i32
    %c0_i32_0 = arith.constant 0 : i32
    %c0_i32_1 = arith.constant 0 : i32
    return %c0_i32, %c0_i32_0 : i32, i32
  }
  func.func @transform_3(%arg0: i32) -> (i32, i32, i32) {
    %c0_i32 = arith.constant 0 : i32
    %c0_i32_0 = arith.constant 0 : i32
    %c0_i32_1 = arith.constant 0 : i32
    return %arg0, %c0_i32, %c0_i32_0 : i32, i32, i32
  }
}

</mosaic_0001>

<bundles_post_ra>
// kernel: tpu_custom_call.1
= control target key start
LH: loop header
LB: loop body
LE: loop exit
PB: predicated region body
PF: predicated region fallthrough
CT: control target
= control target key end

     0   :  { %8 = vsyncpa [#allocation3], 0  ;;  %s625_s0 = inlined_call_operand.hbm [shape: f32[2,32,256], index: 0, kind: input, shape index: {}]   ;;  %s626_s1 = inlined_call_operand.vmem [shape: f32[32,8], index: 1, kind: input, shape index: {}]   ;;  %s627_s2 = inlined_call_operand.vmem [shape: f32[8,32], index: 2, kind: input, shape index: {}]   ;;  %s628_s3 = inlined_call_operand.hbm [shape: f32[2,32,256], index: 3, kind: output, shape index: {}]  }
   0x1   :  { %9 = vsyncpa [#allocation4], 0  ;;  %s481_s12 = smov [#allocation2]   ;;  %s433_s16 = scalar_lea.hbm %s625_s0, 2048 }
   0x2   :  { %s15_s13 = sshll.u32 %s481_s12, 4  ;;  %p434_p0 = scmp.ne.s32.totalorder %s625_s0, %s433_s16  ;;  %s16_s13 = int_to_ptr.vmem [resolvable:$true] %s15_s13 }
   0x3   :  { %p437_p1 = scmp.lt.u32.totalorder %s433_s16, %s625_s0 }
   0x5   :  { %p439_p2 = pnand %p437_p1, %p434_p0 }
   0x7   :  { %442 = shalt.err (!%p439_p2)
}
   0x8   :  { %s443_s21 = scalar_lea.vmem %s16_s13, 2048  ;;  %p448_p4 = scmp.lt.s32.totalorder %s16_s13, %s16_s13 }
   0x9   :  { %p444_p3 = scmp.ne.s32.totalorder %s16_s13, %s443_s21  ;;  %p449_p5 = scmp.lt.s32.totalorder %s443_s21, %s443_s21 }
   0xb   :  { %p450_p6 = por %p449_p5, %p448_p4 }
   0xd   :  { %p451_p7 = pnand %p450_p6, %p444_p3 }
   0xf   :  { %454 = shalt.err (!%p451_p7)
}
  0x10   :  { %s482_s22 = smov 256   ;;  %s483_s23 = smov 16  }
  0x11   :  { %21 = dma.hbm_to_vmem [thread:$0]  %s625_s0, 2048, %s16_s13, [#allocation3], %s482_s22, %s482_s22, %s483_s23  }
  0x12   :  { %477 = dma.done.wait [#allocation3], 2048  }
  0x13   :  { %478 = vsyncadd [#allocation3], 4294965248  ;;  %v523_v0 = vld [vmem:[#allocation2 + $0x40] sm:$0xff]  ;;  %v525_v1 = vld [vmem:[#allocation2 + $0x48] sm:$0xff]  ;;  %v484_v27 = vmov 0.0|0.0   ;;  %vm485_vm0 = vmmov 0   ;;  %v89_v32 = vlaneseq }
  0x14   :  { %v527_v2 = vld [vmem:[#allocation2] sm:$0xff]  ;;  %v57_v3 = vadd.f32 %v525_v1, %v523_v0  ;;  %v531_v4 = vld [vmem:[#allocation2 + $0x8] sm:$0xff]  ;;  %v533_v5 = vld [vmem:[#allocation2 + $0x50] sm:$0xff]  ;;  %412 = vmatprep.subr.bf16.mxu0 %v484_v27  ;;  %v486_v31 = vmov 0.0   ;;  %vm100_vm1 = vcmask 130112   ;;  %vm107_vm2 = vcmask 195712  }
  0x15   :  { %v535_v6 = vld [vmem:[#allocation2 + $0x58] sm:$0xff]  ;;  %v45_v7 = vadd.f32 %v531_v4, %v527_v2  ;;  %v539_v8 = vld [vmem:[#allocation2 + $0x10] sm:$0xff]  ;;  %v547_v12 = vld [vmem:[#allocation2 + $0x60] sm:$0xff]  ;;  %404 = vmatprep.mubr.msk.f32.mxu0 %vm485_vm0, %v486_v31  ;;  %407 = vmatprep.subr.mxu1 %v486_v31  ;;  %v90_v34 = vand.u32 127, %v89_v32  ;;  %v583_v39 = vshrl.u32 %v89_v32, 7  ;;  %vm114_vm3 = vcmask 261312  }
  0x16   :  { %v541_v9 = vld [vmem:[#allocation2 + $0x18] sm:$0xff]  ;;  %58 = vadd.xlane.f32.xlu1 %v57_v3  ;;  %v60_v10 = vadd.f32 %v535_v6, %v533_v5  ;;  %v549_v13 = vld [vmem:[#allocation2 + $0x68] sm:$0xff]  ;;  %v551_v14 = vld [vmem:[#allocation2 + $0x20] sm:$0xff]  ;;  %409 = vmatprep.mubr.msk.f32.mxu1 %vm485_vm0, %v486_v31  ;;  %vm135_vm4 = vcmask 1041409   ;;  %vm137_vm5 = vcmask 261120   ;;  %vm218_vm6 = vcmask 64512  }
  0x17   :  { %46 = vadd.xlane.f32.xlu0 %v45_v7  ;;  %v48_v11 = vadd.f32 %v541_v9, %v539_v8  ;;  %v553_v15 = vld [vmem:[#allocation2 + $0x28] sm:$0xff]  ;;  %v63_v16 = vadd.f32 %v549_v13, %v547_v12  ;;  %v559_v18 = vld [vmem:[#allocation2 + $0x70] sm:$0xff]  ;;  %v561_v19 = vld [vmem:[#allocation2 + $0x78] sm:$0xff]  ;;  %v95_v36 = vadd.s32 4294967288, %v90_v34  ;;  %v102_v38 = vadd.s32 4294967280, %v90_v34 }
  0x18   :  { %v51_v17 = vadd.f32 %v553_v15, %v551_v14  ;;  %v563_v20 = vld [vmem:[#allocation2 + $0x30] sm:$0xff]  ;;  %v565_v21 = vld [vmem:[#allocation2 + $0x38] sm:$0xff]  ;;  %v66_v22 = vadd.f32 %v561_v19, %v559_v18  ;;  %v77_v24 = vld [vmem:[%s626_s1] sm:$0xff]  ;;  %v109_v43 = vadd.s32 4294967272, %v90_v34  ;;  %v93_v47 = vsub.s32 %v90_v34, %v583_v39 }
  0x19   :  { %v54_v23 = vadd.f32 %v565_v21, %v563_v20  ;;  %v78_v25 = vld [vmem:[%s626_s1 + $0x8] sm:$0xff]  ;;  %v79_v28 = vld [vmem:[%s626_s1 + $0x10] sm:$0xff]  ;;  %v80_v29 = vld [vmem:[%s626_s1 + $0x18] sm:$0xff]  ;;  %v98_v41 = vsub.s32 %v95_v36, %v583_v39  ;;  %v105_v45 = vsub.s32 %v102_v38, %v583_v39  ;;  %v300_v38 = vsub.s32 0, %v583_v39 }
  0x1a   :  { %61 = vadd.xlane.f32.xlu1 %v60_v10  ;;  %v413_v26 = vpack.c.bf16 %v78_v25, %v77_v24  ;;  %v416_v30 = vpack.c.bf16 %v80_v29, %v79_v28  ;;  %v112_v54 = vsub.s32 %v109_v43, %v583_v39  ;;  %v217_v25 = vld [vmem:[%s627_s2] sm:$0xff]  ;;  %s487_s2 = smov [#allocation5]  }
  0x1b   :  { %49 = vadd.xlane.f32.xlu0 %v48_v11  ;;  %408 = vmatpush3.msra.mxu1 %v217_v25  ;;  %s373_s7 = sshll.u32 %s487_s2, 4  ;;  %s374_s7 = int_to_ptr.vmem [resolvable:$true] %s373_s7 }
  0x1c   :  { %414 = vmatpush3.bf16.msra.mxu0 %v413_v26  ;;  %s455_s8 = scalar_lea.vmem %s374_s7, 2048  ;;  %p460_p9 = scmp.lt.s32.totalorder %s374_s7, %s374_s7 }
  0x1d   :  { %415 = vmatprep.subr.bf16.mxu0 %v484_v27  ;;  %p456_p8 = scmp.ne.s32.totalorder %s374_s7, %s455_s8  ;;  %p461_p10 = scmp.lt.s32.totalorder %s455_s8, %s455_s8 }
  0x1e   :  { %64 = vadd.xlane.f32.xlu1 %v63_v16 }
  0x1f   :  { %52 = vadd.xlane.f32.xlu0 %v51_v17  ;;  %p462_p11 = por %p461_p10, %p460_p9 }
  0x20   :  { %417 = vmatpush3.bf16.msra.mxu0 %v416_v30 }
  0x21   :  { %p463_p12 = pnand %p462_p11, %p456_p8 }
  0x22   :  { %67 = vadd.xlane.f32.xlu1 %v66_v22 }
  0x23   :  { %55 = vadd.xlane.f32.xlu0 %v54_v23 }
  0xa3   :  { %v59_v33 = vpop.xlane.xlu1 %58 }
  0xa4   :  { %v47_v35 = vpop.xlane.xlu0 %46  ;;  %v73_v48 = vmul.f32 0.00390625, %v59_v33 }
  0xa5   :  { %v69_v51 = vmul.f32 0.00390625, %v47_v35 }
  0xa6   :  { %v119_v58 = vrot.slane %v73_v48, %v93_v47 }
  0xa7   :  { %v62_v37 = vpop.xlane.xlu1 %61  ;;  %v94_v62 = vrot.slane %v69_v51, %v93_v47 }
  0xa8   :  { %v50_v40 = vpop.xlane.xlu0 %49  ;;  %v74_v42 = vmul.f32 0.00390625, %v62_v37 }
  0xa9   :  { %v70_v44 = vmul.f32 0.00390625, %v50_v40 }
  0xaa   :  { %v123_v53 = vrot.slane %v74_v42, %v98_v41  ;;  %v319_v42 = vsub.s32 1, %v583_v39 }
  0xab   :  { %v65_v46 = vpop.xlane.xlu1 %64  ;;  %v99_v55 = vrot.slane %v70_v44, %v98_v41 }
  0xac   :  { %v75_v49 = vmul.f32 0.00390625, %v65_v46  ;;  %v53_v50 = vpop.xlane.xlu0 %52  ;;  %v124_v3 = vsel %vm100_vm1, %v123_v53, %v119_v58 }
  0xad   :  { %v71_v52 = vmul.f32 0.00390625, %v53_v50  ;;  %v101_v10 = vsel %vm100_vm1, %v99_v55, %v94_v62 }
  0xae   :  { %v128_v56 = vrot.slane %v75_v49, %v105_v45 }
  0xaf   :  { %v68_v57 = vpop.xlane.xlu1 %67  ;;  %v106_v59 = vrot.slane %v71_v52, %v105_v45 }
  0xb0   :  { %v76_v60 = vmul.f32 0.00390625, %v68_v57  ;;  %v56_v61 = vpop.xlane.xlu0 %55  ;;  %v129_v11 = vsel %vm107_vm2, %v128_v56, %v124_v3 }
  0xb1   :  { %v72_v63 = vmul.f32 0.00390625, %v56_v61  ;;  %v108_v17 = vsel %vm107_vm2, %v106_v59, %v101_v10 }
  0xb2   :  { %v133_v7 = vrot.slane %v76_v60, %v112_v54 }
  0xb3   :  { %v113_v16 = vrot.slane %v72_v63, %v112_v54 }
  0xb4   :  { %v134_v22 = vsel %vm114_vm3, %v133_v7, %v129_v11 }
  0xb5   :  { %v115_v23 = vsel %vm114_vm3, %v113_v16, %v108_v17 }
  0xb6   :  { %v136_v24 = vsel %vm135_vm4, %v134_v22, %v115_v23 }
  0xb7   :  { %405 = vmatmul.mubr.msk.f32.vlgmr.msra.gmra.mrb[0].mxu0 %vm137_vm5, %v136_v24 }
 0x18a   :  { %v206_v26 = vpop.f32.mrb[0].mxu0 }
 0x18b   :  { %v386_v27 = vmul.f32 -1.442695, %v206_v26  ;;  %v406_v28 = vpop.f32.mrb[1].mxu0 }
 0x18d   :  { %425 = vpow2.f32 %v386_v27 }
 0x197   :  { %v426_v29 = vpop.eup %425 }
 0x198   :  { %v213_v30 = vadd.f32 1.0, %v426_v29 }
 0x19a   :  { %427 = vrcp.f32 %v213_v30 }
 0x1a4   :  { %v428_v31 = vpop.eup %427 }
 0x1a5   :  { %v216_v32 = vmul.f32 %v428_v31, %v206_v26 }
 0x1a7   :  { %410 = vmatmul.mubr.msk.f32.vlgmr.msra.gmra.mrb[0].mxu1 %vm218_vm6, %v216_v32 }
 0x27a   :  { %v288_v33 = vpop.f32.mrb[0].mxu1 }
 0x27b   :  { %v388_v34 = vmul.f32 -1.442695, %v288_v33  ;;  %v411_v35 = vpop.f32.mrb[1].mxu1 }
 0x27d   :  { %429 = vpow2.f32 %v388_v34 }
 0x287   :  { %v430_v36 = vpop.eup %429 }
 0x288   :  { %v295_v37 = vadd.f32 1.0, %v430_v36 }
 0x28a   :  { %431 = vrcp.f32 %v295_v37 }
 0x294   :  { %v432_v40 = vpop.eup %431 }
 0x295   :  { %v301_v41 = vrot.slane %v432_v40, %v300_v38  ;;  %v320_v43 = vrot.slane %v432_v40, %v319_v42 }
 0x297   :  { %307 = vbcast.lane.b32.xlu1 %v301_v41, 264  ;;  %303 = vbcast.lane.b32.xlu0 %v301_v41, 256 }
 0x29b   :  { %311 = vbcast.lane.b32.xlu1 %v301_v41, 272  ;;  %322 = vbcast.lane.b32.xlu0 %v320_v43, 256 }
 0x29f   :  { %315 = vbcast.lane.b32.xlu1 %v301_v41, 280  ;;  %330 = vbcast.lane.b32.xlu0 %v320_v43, 272 }
 0x2a3   :  { %326 = vbcast.lane.b32.xlu1 %v320_v43, 264 }
 0x2a7   :  { %334 = vbcast.lane.b32.xlu1 %v320_v43, 280 }
 0x309   :  { %v308_v44 = vpop.permute.xlu1 %307  ;;  %v304_v45 = vpop.permute.xlu0 %303 }
 0x30a   :  { %v338_v46 = vmul.f32 %v308_v44, %v539_v8  ;;  %v339_v47 = vmul.f32 %v308_v44, %v541_v9  ;;  %v336_v48 = vmul.f32 %v304_v45, %v527_v2  ;;  %v337_v49 = vmul.f32 %v304_v45, %v531_v4 }
 0x30c   :  { %354 = vst [vmem:[#allocation5 + $0x10] sm:$0xff] %v338_v46  ;;  %355 = vst [vmem:[#allocation5 + $0x18] sm:$0xff] %v339_v47 }
 0x30d   :  { %352 = vst [vmem:[#allocation5] sm:$0xff] %v336_v48  ;;  %353 = vst [vmem:[#allocation5 + $0x8] sm:$0xff] %v337_v49  ;;  %v312_v39 = vpop.permute.xlu1 %311  ;;  %v323_v50 = vpop.permute.xlu0 %322 }
 0x30e   :  { %v340_v51 = vmul.f32 %v312_v39, %v551_v14  ;;  %v341_v52 = vmul.f32 %v312_v39, %v553_v15  ;;  %v344_v53 = vmul.f32 %v323_v50, %v523_v0  ;;  %v345_v8 = vmul.f32 %v323_v50, %v525_v1 }
 0x310   :  { %356 = vst [vmem:[#allocation5 + $0x20] sm:$0xff] %v340_v51  ;;  %357 = vst [vmem:[#allocation5 + $0x28] sm:$0xff] %v341_v52 }
 0x311   :  { %360 = vst [vmem:[#allocation5 + $0x40] sm:$0xff] %v344_v53  ;;  %361 = vst [vmem:[#allocation5 + $0x48] sm:$0xff] %v345_v8  ;;  %v316_v2 = vpop.permute.xlu1 %315  ;;  %v331_v4 = vpop.permute.xlu0 %330 }
 0x312   :  { %v342_v9 = vmul.f32 %v316_v2, %v563_v20  ;;  %v343_v54 = vmul.f32 %v316_v2, %v565_v21  ;;  %v348_v55 = vmul.f32 %v331_v4, %v547_v12  ;;  %v349_v14 = vmul.f32 %v331_v4, %v549_v13 }
 0x314   :  { %358 = vst [vmem:[#allocation5 + $0x30] sm:$0xff] %v342_v9  ;;  %359 = vst [vmem:[#allocation5 + $0x38] sm:$0xff] %v343_v54 }
 0x315   :  { %364 = vst [vmem:[#allocation5 + $0x60] sm:$0xff] %v348_v55  ;;  %365 = vst [vmem:[#allocation5 + $0x68] sm:$0xff] %v349_v14  ;;  %v327_v0 = vpop.permute.xlu1 %326 }
 0x316   :  { %v346_v1 = vmul.f32 %v327_v0, %v533_v5  ;;  %v347_v15 = vmul.f32 %v327_v0, %v535_v6 }
 0x318   :  { %362 = vst [vmem:[#allocation5 + $0x50] sm:$0xff] %v346_v1  ;;  %363 = vst [vmem:[#allocation5 + $0x58] sm:$0xff] %v347_v15 }
 0x319   :  { %v335_v20 = vpop.permute.xlu1 %334 }
 0x31a   :  { %v350_v21 = vmul.f32 %v335_v20, %v559_v18  ;;  %v351_v12 = vmul.f32 %v335_v20, %v561_v19 }
 0x31c   :  { %366 = vst [vmem:[#allocation5 + $0x70] sm:$0xff] %v350_v21  ;;  %367 = vst [vmem:[#allocation5 + $0x78] sm:$0xff] %v351_v12 }
 0x31d   :  { %466 = shalt.err (!%p463_p12)
}
 0x31e   :  { %s467_s11 = scalar_lea.hbm %s628_s3, 2048 }
 0x31f   :  { %p468_p13 = scmp.ne.s32.totalorder %s628_s3, %s467_s11  ;;  %p471_p0 = scmp.lt.u32.totalorder %s467_s11, %s628_s3 }
 0x321   :  { %p473_p1 = pnand %p471_p0, %p468_p13 }
 0x323   :  { %476 = shalt.err (!%p473_p1)
}
 0x324   :  { %379 = dma.vmem_to_hbm [thread:$0]  %s374_s7, 2048, %s628_s3, [#allocation4], %s482_s22, %s482_s22, %s483_s23  }
 0x325   :  { %479 = dma.done.wait [#allocation4], 2048  }
 0x326   :  { %480 = vsyncadd [#allocation4], 4294965248 }
 0x327   :  { %383 = vsyncpa [#allocation3], 1 }
 0x328   :  { %384 = vsyncpa [#allocation4], 1 }

</bundles_post_ra>
